<compile_context>
chip_gen: v6e
topology: v6e:2x2x1
jax: 0.10.0
libtpu: 0.0.40
codegen_flags: <defaults>
</compile_context>

<pallas_src>
from functools import partial

import jax
import jax.numpy as jnp
from jax import lax
from jax.experimental import pallas as pl
from jax.experimental.pallas import tpu as pltpu

_MIB = 1024 * 1024


def _choose_tile(dim, pref, mult):
    """Largest tile <= pref that is a multiple of `mult` and divides `dim`
    (falls back to the full dimension)."""
    if dim <= pref:
        return dim
    t = (pref // mult) * mult
    while t >= mult:
        if dim % t == 0:
            return t
        t -= mult
    return dim


def _vmem_limit(est_bytes):
    # Scoped-VMEM default is 16 MiB (v5e) / 32 MiB (v6e, v7x); raise it to the
    # actual footprint plus headroom, never past v7x's 64 MiB physical VMEM.
    return int(min(max(est_bytes + 4 * _MIB, 16 * _MIB), 64 * _MIB))


# ----------------------------------------------------------------------------
# Fused Q/K/V projection kernel:  o_x = x_x @ w_x + b_x   for x in {q, k, v}
# Grid (M-tile, N-tile, K-tile); K innermost with f32 VMEM accumulators.
# ----------------------------------------------------------------------------
def _qkv_body(x_refs, w_refs, b_refs, o_refs, acc_refs):
    kk = pl.program_id(2)
    last = pl.num_programs(2) - 1
    for x_ref, w_ref, b_ref, o_ref, acc_ref in zip(x_refs, w_refs, b_refs,
                                                   o_refs, acc_refs):
        @pl.when(kk == 0)
        def _init(acc_ref=acc_ref):
            acc_ref[...] = jnp.zeros_like(acc_ref)

        acc_ref[...] += jnp.dot(x_ref[...], w_ref[...],
                                preferred_element_type=jnp.float32)

        @pl.when(kk == last)
        def _finish(acc_ref=acc_ref, b_ref=b_ref, o_ref=o_ref):
            o_ref[...] = (acc_ref[...] + b_ref[...]).astype(o_ref.dtype)


def _qkv_kernel_distinct(xq_ref, xk_ref, xv_ref, wq_ref, wk_ref, wv_ref,
                         bq_ref, bk_ref, bv_ref, oq_ref, ok_ref, ov_ref,
                         aq_ref, ak_ref, av_ref):
    _qkv_body((xq_ref, xk_ref, xv_ref), (wq_ref, wk_ref, wv_ref),
              (bq_ref, bk_ref, bv_ref), (oq_ref, ok_ref, ov_ref),
              (aq_ref, ak_ref, av_ref))


def _qkv_kernel_shared(x_ref, wq_ref, wk_ref, wv_ref,
                       bq_ref, bk_ref, bv_ref, oq_ref, ok_ref, ov_ref,
                       aq_ref, ak_ref, av_ref):
    # Self-attention path: one X tile feeds all three projections (1/3 the
    # activation DMA and VMEM of the distinct-input variant).
    _qkv_body((x_ref, x_ref, x_ref), (wq_ref, wk_ref, wv_ref),
              (bq_ref, bk_ref, bv_ref), (oq_ref, ok_ref, ov_ref),
              (aq_ref, ak_ref, av_ref))


def qkv_projections(xq, xk, xv, wq, bq, wk, bk, wv, bv, *,
                    tm=512, tn=256, tk=512):
    shared_x = (xq is xk) and (xk is xv)
    M, Din = xq.shape
    Dout = wq.shape[1]
    tm = _choose_tile(M, tm, 8)
    tn = _choose_tile(Dout, tn, 128)
    tk = _choose_tile(Din, tk, 128)

    x_spec = pl.BlockSpec((tm, tk), lambda i, j, k: (i, k))
    w_spec = pl.BlockSpec((tk, tn), lambda i, j, k: (k, j))
    b_spec = pl.BlockSpec((1, tn), lambda i, j, k: (0, j))
    o_spec = pl.BlockSpec((tm, tn), lambda i, j, k: (i, j))
    out_sds = jax.ShapeDtypeStruct((M, Dout), xq.dtype)

    dsize = jnp.dtype(xq.dtype).itemsize
    n_x = 1 if shared_x else 3
    est = ((2 * n_x * tm * tk + 2 * 3 * tk * tn + 2 * 3 * tm * tn
            + 2 * 3 * tn) * dsize + 3 * tm * tn * 4)
    cost = pl.CostEstimate(
        flops=3 * 2 * M * Din * Dout,
        transcendentals=0,
        bytes_accessed=int((n_x * M * Din + 3 * Din * Dout + 3 * M * Dout)
                           * dsize))

    if shared_x:
        kernel = _qkv_kernel_shared
        in_specs = [x_spec] + [w_spec] * 3 + [b_spec] * 3
        args = (xq, wq, wk, wv,
                bq.reshape(1, -1), bk.reshape(1, -1), bv.reshape(1, -1))
    else:
        kernel = _qkv_kernel_distinct
        in_specs = [x_spec] * 3 + [w_spec] * 3 + [b_spec] * 3
        args = (xq, xk, xv, wq, wk, wv,
                bq.reshape(1, -1), bk.reshape(1, -1), bv.reshape(1, -1))

    return pl.pallas_call(
        kernel,
        grid=(M // tm, Dout // tn, Din // tk),
        in_specs=in_specs,
        out_specs=(o_spec, o_spec, o_spec),
        out_shape=(out_sds, out_sds, out_sds),
        scratch_shapes=[pltpu.VMEM((tm, tn), jnp.float32) for _ in range(3)],
        compiler_params=pltpu.CompilerParams(
            dimension_semantics=("parallel", "parallel", "arbitrary"),
            vmem_limit_bytes=_vmem_limit(est)),
        cost_estimate=cost,
    )(*args)


# ----------------------------------------------------------------------------
# Generic tiled linear kernel:  o = x @ w + b   (output projection)
# ----------------------------------------------------------------------------
def _linear_kernel(x_ref, w_ref, b_ref, o_ref, acc_ref):
    kk = pl.program_id(2)

    @pl.when(kk == 0)
    def _init():
        acc_ref[...] = jnp.zeros_like(acc_ref)

    acc_ref[...] += jnp.dot(x_ref[...], w_ref[...],
                            preferred_element_type=jnp.float32)

    @pl.when(kk == pl.num_programs(2) - 1)
    def _finish():
        o_ref[...] = (acc_ref[...] + b_ref[...]).astype(o_ref.dtype)


def linear(x2d, w, b, *, tm=512, tn=256, tk=512):
    M, Din = x2d.shape
    Dout = w.shape[1]
    tm = _choose_tile(M, tm, 8)
    tn = _choose_tile(Dout, tn, 128)
    tk = _choose_tile(Din, tk, 128)

    dsize = jnp.dtype(x2d.dtype).itemsize
    est = (2 * tm * tk + 2 * tk * tn + 2 * tm * tn + 2 * tn) * dsize \
        + tm * tn * 4
    cost = pl.CostEstimate(
        flops=2 * M * Din * Dout, transcendentals=0,
        bytes_accessed=int((M * Din + Din * Dout + M * Dout) * dsize))

    return pl.pallas_call(
        _linear_kernel,
        grid=(M // tm, Dout // tn, Din // tk),
        in_specs=[pl.BlockSpec((tm, tk), lambda i, j, k: (i, k)),
                  pl.BlockSpec((tk, tn), lambda i, j, k: (k, j)),
                  pl.BlockSpec((1, tn), lambda i, j, k: (0, j))],
        out_specs=pl.BlockSpec((tm, tn), lambda i, j, k: (i, j)),
        out_shape=jax.ShapeDtypeStruct((M, Dout), x2d.dtype),
        scratch_shapes=[pltpu.VMEM((tm, tn), jnp.float32)],
        compiler_params=pltpu.CompilerParams(
            dimension_semantics=("parallel", "parallel", "arbitrary"),
            vmem_limit_bytes=_vmem_limit(est)),
        cost_estimate=cost,
    )(x2d, w, b.reshape(1, -1))


# ----------------------------------------------------------------------------
# Attention core kernel: one (batch, query-tile) per grid point.
#   q block : (1, H, tq, d_k)   k/v blocks : (1, H, S, d_k)   [head-major]
#   mask    : (1, tq, S) int8 (optional)
#   outputs : attended values (1, tq, D) lane-dense, D = H*d_k
#             attention weights (1, H, tq, S) (optional, default bf16)
# ----------------------------------------------------------------------------
def _attn_kernel(q_ref, k_ref, v_ref, *rest, n_heads, has_mask, emit_weights):
    idx = 0
    if has_mask:
        m_ref = rest[idx]
        idx += 1
    o_ref = rest[idx]
    idx += 1
    w_ref = rest[idx] if emit_weights else None

    q = q_ref[0]        # (H, tq, dk) -- 1/sqrt(dk) already folded into q-proj
    k = k_ref[0]        # (H, S,  dk)
    v = v_ref[0]        # (H, S,  dk)

    # scores: (H, tq, S); leading batch dim -> no per-step operand relayouts.
    s = lax.dot_general(
        q, k,
        dimension_numbers=(((2,), (2,)), ((0,), (0,))),
        preferred_element_type=jnp.float32,
    )

    if has_mask:
        m = m_ref[0]    # (tq, S) int8; 0 == masked out
        s = jnp.where(m[None, :, :] == 0, jnp.float32(-1000000000.0), s)

    # softmax over keys (exact reciprocal: the weights are an exported probe)
    s = s - jnp.max(s, axis=-1, keepdims=True)
    p = jnp.exp(s)
    p = p * pl.reciprocal(jnp.sum(p, axis=-1, keepdims=True), approx=False)

    if emit_weights:
        w_ref[0] = p.astype(w_ref.dtype)                  # (H, tq, S)

    # TODO(synk): training-mode dropout(0.1) on p via pltpu.prng_random_bits.

    # attn @ V: (H, tq, dk), f32 accumulation, leading batch dim.
    o = lax.dot_general(
        p.astype(v.dtype), v,
        dimension_numbers=(((2,), (1,)), ((0,), (0,))),
        preferred_element_type=jnp.float32,
    )

    # Merge heads in VMEM and store ONE lane-dense (tq, D) slab
    # (no per-head sub-128-lane masked stores).
    o_ref[0] = jnp.concatenate([o[h] for h in range(n_heads)],
                               axis=-1).astype(o_ref.dtype)


def attention_core(qh, kh, vh, mask_bss, *, tq_pref=128,
                   weights_dtype=jnp.bfloat16, emit_weights=True):
    B, H, S, dk = qh.shape
    D = H * dk
    has_mask = mask_bss is not None
    dsize = jnp.dtype(qh.dtype).itemsize
    wsize = jnp.dtype(weights_dtype).itemsize

    def est_bytes(tq):
        e = 2 * H * tq * dk * dsize            # q block (double-buffered)
        e += 2 * 2 * H * S * dk * dsize        # k + v blocks
        e += 2 * tq * D * dsize                # lane-dense attention output
        if emit_weights:
            e += 2 * H * tq * S * wsize        # weights probe block
        if has_mask:
            e += 2 * tq * S                    # int8 mask block
        e += 3 * H * tq * S * 4                # f32 s/p intermediates headroom
        return e

    # Adapt the q-tile so the per-step footprint stays clear of v7x's 64 MiB.
    budget = 44 * _MIB
    cand = tq_pref
    tq = _choose_tile(S, cand, 8)
    while est_bytes(tq) > budget and cand > 8:
        cand = max(8, cand // 2)
        tq = _choose_tile(S, cand, 8)

    kern = partial(_attn_kernel, n_heads=H, has_mask=has_mask,
                   emit_weights=emit_weights)

    q_spec = pl.BlockSpec((1, H, tq, dk), lambda bi, qi: (bi, 0, qi, 0))
    kv_spec = pl.BlockSpec((1, H, S, dk), lambda bi, qi: (bi, 0, 0, 0))
    in_specs = [q_spec, kv_spec, kv_spec]
    args = [qh, kh, vh]
    if has_mask:
        in_specs.append(pl.BlockSpec((1, tq, S), lambda bi, qi: (bi, qi, 0)))
        args.append(mask_bss)

    out_specs = [pl.BlockSpec((1, tq, D), lambda bi, qi: (bi, qi, 0))]
    out_shape = [jax.ShapeDtypeStruct((B, S, D), qh.dtype)]
    if emit_weights:
        out_specs.append(
            pl.BlockSpec((1, H, tq, S), lambda bi, qi: (bi, 0, qi, 0)))
        out_shape.append(jax.ShapeDtypeStruct((B, H, S, S), weights_dtype))

    bytes_accessed = 4 * B * S * D * dsize
    if emit_weights:
        bytes_accessed += B * H * S * S * wsize
    if has_mask:
        bytes_accessed += B * S * S
    cost = pl.CostEstimate(flops=4 * B * H * S * S * dk,
                           transcendentals=B * H * S * S,
                           bytes_accessed=int(bytes_accessed))

    res = pl.pallas_call(
        kern,
        grid=(B, S // tq),
        in_specs=in_specs,
        out_specs=tuple(out_specs),
        out_shape=tuple(out_shape),
        compiler_params=pltpu.CompilerParams(
            # K/V blocks are constant over the q-tile axis -> mark it
            # "arbitrary" so megacore (v7x) shards over batch and K/V stays
            # resident instead of being re-DMA'd by each core.
            dimension_semantics=("parallel", "arbitrary"),
            vmem_limit_bytes=_vmem_limit(est_bytes(tq))),
        cost_estimate=cost,
    )(*args)

    if emit_weights:
        out_bsd, attn_w = res
    else:
        (out_bsd,) = res
        attn_w = None
    return out_bsd, attn_w


# ----------------------------------------------------------------------------
# ProbedAttention forward (inference)
# ----------------------------------------------------------------------------
def init_params(key, d_model):
    ks = jax.random.split(key, 8)
    scale = 1.0 / jnp.sqrt(jnp.float32(d_model))

    def lin(kw, kb):
        # stored as (Din, Dout), i.e. torch_weight.T
        w = jax.random.uniform(kw, (d_model, d_model), jnp.float32, -scale, scale)
        b = jax.random.uniform(kb, (d_model,), jnp.float32, -scale, scale)
        return w, b

    wq, bq = lin(ks[0], ks[1])
    wk, bk = lin(ks[2], ks[3])
    wv, bv = lin(ks[4], ks[5])
    wo, bo = lin(ks[6], ks[7])
    return dict(wq=wq, bq=bq, wk=wk, bk=bk, wv=wv, bv=bv, wo=wo, bo=bo)


def probed_attention_forward(params, q, k, v, n_heads, mask=None, *,
                             weights_dtype=jnp.bfloat16, return_weights=True):
    B, S, D = q.shape
    assert D % n_heads == 0
    dk = D // n_heads
    scale = 1.0 / (float(dk) ** 0.5)

    # Fold 1/sqrt(d_k) into the Q-projection parameters (exact same math as
    # dividing the scores; zero in-kernel cost; multiply done in f32 even when
    # the stored parameters are bf16).
    wq = (params["wq"].astype(jnp.float32) * scale).astype(params["wq"].dtype)
    bq = (params["bq"].astype(jnp.float32) * scale).astype(params["bq"].dtype)

    if (q is k) and (k is v):            # self-attention: DMA X once, not 3x
        x2 = q.reshape(B * S, D)
        q2 = k2 = v2 = x2
    else:
        q2 = q.reshape(B * S, D)
        k2 = k.reshape(B * S, D)
        v2 = v.reshape(B * S, D)

    qp, kp, vp = qkv_projections(q2, k2, v2,
                                 wq, bq,
                                 params["wk"], params["bk"],
                                 params["wv"], params["bv"])

    # Head-major (B, H, S, d_k): one XLA transpose per tensor so both
    # attention dot_generals have LEADING batch dims (no per-step relayouts).
    qh = qp.reshape(B, S, n_heads, dk).transpose(0, 2, 1, 3)
    kh = kp.reshape(B, S, n_heads, dk).transpose(0, 2, 1, 3)
    vh = vp.reshape(B, S, n_heads, dk).transpose(0, 2, 1, 3)

    if mask is None:
        mask_bss = None
    else:
        m = jnp.asarray(mask)
        if m.ndim == 2:
            m = m[None, None]
        elif m.ndim == 3:
            m = m[:, None]
        if m.ndim != 4:
            raise ValueError(f"unsupported mask rank: {m.ndim}")
        if m.shape[1] != 1:
            # TODO(synk): head-dependent (B, H, S, S) masks need an H-indexed
            #             mask BlockSpec.
            raise NotImplementedError("head-dependent masks are not supported")
        m = jnp.broadcast_to(m, (B, 1, S, S))[:, 0]   # (B, S, S) -- never over H
        mask_bss = (m != 0).astype(jnp.int8)

    out_bsd, attn_weights = attention_core(
        qh, kh, vh, mask_bss,
        weights_dtype=weights_dtype, emit_weights=return_weights)

    # attention output is already lane-dense (B, S, D): free reshape to 2D.
    out = linear(out_bsd.reshape(B * S, D),
                 params["wo"], params["bo"]).reshape(B, S, D)
    return out, attn_weights


# ----------------------------------------------------------------------------
# Pure-JAX reference (correctness check)
# ----------------------------------------------------------------------------
def reference_forward(params, q, k, v, n_heads, mask=None):
    B, S, D = q.shape
    dk = D // n_heads
    qp = q @ params["wq"] + params["bq"]
    kp = k @ params["wk"] + params["bk"]
    vp = v @ params["wv"] + params["bv"]
    qh = qp.reshape(B, S, n_heads, dk).transpose(0, 2, 1, 3)
    kh = kp.reshape(B, S, n_heads, dk).transpose(0, 2, 1, 3)
    vh = vp.reshape(B, S, n_heads, dk).transpose(0, 2, 1, 3)
    s = jnp.einsum("bhqd,bhkd->bhqk", qh, kh) / jnp.sqrt(jnp.float32(dk))
    if mask is not None:
        s = jnp.where(mask == 0, -1000000000.0, s)
    p = jax.nn.softmax(s, axis=-1)
    o = jnp.einsum("bhqk,bhkd->bhqd", p, vh)
    o = o.transpose(0, 2, 1, 3).reshape(B, S, D)
    o = o @ params["wo"] + params["bo"]
    return o, p


if __name__ == "__main__":
    B, S, d_model, n_heads = 2, 8, 32, 4

    key = jax.random.PRNGKey(0)
    kparam, kq_, kk_, kv_ = jax.random.split(key, 4)
    params = init_params(kparam, d_model)
    q = jax.random.normal(kq_, (B, S, d_model), jnp.float32)
    k = jax.random.normal(kk_, (B, S, d_model), jnp.float32)
    v = jax.random.normal(kv_, (B, S, d_model), jnp.float32)

    # --- f32, no mask; probe weights in bf16 (default -> half the HBM stream)
    out, attn_w = probed_attention_forward(params, q, k, v, n_heads, mask=None)
    out = jax.block_until_ready(out)
    attn_w = jax.block_until_ready(attn_w)
    ref_out, ref_w = reference_forward(params, q, k, v, n_heads, mask=None)
    assert out.shape == (B, S, d_model)
    assert attn_w.shape == (B, n_heads, S, S) and attn_w.dtype == jnp.bfloat16
    assert jnp.allclose(out, ref_out, atol=5e-3, rtol=5e-3)
    assert jnp.allclose(attn_w.astype(jnp.float32), ref_w, atol=2e-2, rtol=2e-2)

    # --- f32, causal mask, full-precision probe weights on request ---
    causal = jnp.tril(jnp.ones((S, S), jnp.float32))[None, None]   # (1,1,S,S)
    out_m, attn_m = probed_attention_forward(
        params, q, k, v, n_heads, mask=causal, weights_dtype=jnp.float32)
    out_m = jax.block_until_ready(out_m)
    attn_m = jax.block_until_ready(attn_m)
    ref_out_m, ref_w_m = reference_forward(params, q, k, v, n_heads, mask=causal)
    assert jnp.allclose(out_m, ref_out_m, atol=5e-3, rtol=5e-3)
    assert jnp.allclose(attn_m, ref_w_m, atol=5e-3, rtol=5e-3)

    # --- weights probe skipped entirely (return_weights=False) ---
    out_nw, w_none = probed_attention_forward(
        params, q, k, v, n_heads, mask=None, return_weights=False)
    out_nw = jax.block_until_ready(out_nw)
    assert w_none is None
    assert jnp.allclose(out_nw, ref_out, atol=5e-3, rtol=5e-3)

    # --- self-attention path (q is k is v): exercises the shared-X QKV kernel
    out_s, attn_s = probed_attention_forward(
        params, q, q, q, n_heads, mask=None, weights_dtype=jnp.float32)
    out_s = jax.block_until_ready(out_s)
    attn_s = jax.block_until_ready(attn_s)
    ref_out_s, ref_w_s = reference_forward(params, q, q, q, n_heads, mask=None)
    assert jnp.allclose(out_s, ref_out_s, atol=5e-3, rtol=5e-3)
    assert jnp.allclose(attn_s, ref_w_s, atol=5e-3, rtol=5e-3)

    # --- bf16 fast path (MXU bf16 inputs, f32 accumulation) — smoke test ---
    params16 = jax.tree.map(lambda a: a.astype(jnp.bfloat16), params)
    out16, attn16 = probed_attention_forward(
        params16, q.astype(jnp.bfloat16), k.astype(jnp.bfloat16),
        v.astype(jnp.bfloat16), n_heads, mask=None)
    out16 = jax.block_until_ready(out16)
    attn16 = jax.block_until_ready(attn16)
    assert out16.shape == (B, S, d_model) and out16.dtype == jnp.bfloat16
    assert attn16.dtype == jnp.bfloat16
    assert bool(jnp.isfinite(out16.astype(jnp.float32)).all())
    assert bool(jnp.isfinite(attn16.astype(jnp.float32)).all())

    print("KERNEL_OK")
</pallas_src>

<mosaic_0001>
module attributes {stable_mosaic.version = 11 : i64} {
  func.func @_qkv_kernel_distinct(%arg0: i32, %arg1: i32, %arg2: i32, %arg3: memref<16x32xf32, #tpu.memory_space<vmem>>, %arg4: memref<16x32xf32, #tpu.memory_space<vmem>>, %arg5: memref<16x32xf32, #tpu.memory_space<vmem>>, %arg6: memref<32x32xf32, #tpu.memory_space<vmem>>, %arg7: memref<32x32xf32, #tpu.memory_space<vmem>>, %arg8: memref<32x32xf32, #tpu.memory_space<vmem>>, %arg9: memref<1x32xf32, #tpu.memory_space<vmem>>, %arg10: memref<1x32xf32, #tpu.memory_space<vmem>>, %arg11: memref<1x32xf32, #tpu.memory_space<vmem>>, %arg12: memref<16x32xf32, #tpu.memory_space<vmem>>, %arg13: memref<16x32xf32, #tpu.memory_space<vmem>>, %arg14: memref<16x32xf32, #tpu.memory_space<vmem>>, %arg15: memref<16x32xf32, #tpu.memory_space<vmem>>, %arg16: memref<16x32xf32, #tpu.memory_space<vmem>>, %arg17: memref<16x32xf32, #tpu.memory_space<vmem>>) attributes {dimension_semantics = [#tpu.dimension_semantics<parallel>, #tpu.dimension_semantics<parallel>, #tpu.dimension_semantics<arbitrary>], iteration_bounds = array<i64: 1, 1, 1>, scalar_prefetch = 0 : i64, scratch_operands = 3 : i64, tpu.core_type = #tpu.core_type<tc>, window_params = [{transform_indices = @transform_0, window_bounds = array<i64: 16, 32>}, {transform_indices = @transform_1, window_bounds = array<i64: 16, 32>}, {transform_indices = @transform_2, window_bounds = array<i64: 16, 32>}, {transform_indices = @transform_3, window_bounds = array<i64: 32, 32>}, {transform_indices = @transform_4, window_bounds = array<i64: 32, 32>}, {transform_indices = @transform_5, window_bounds = array<i64: 32, 32>}, {transform_indices = @transform_6, window_bounds = array<i64: 1, 32>}, {transform_indices = @transform_7, window_bounds = array<i64: 1, 32>}, {transform_indices = @transform_8, window_bounds = array<i64: 1, 32>}, {transform_indices = @transform_9, window_bounds = array<i64: 16, 32>}, {transform_indices = @transform_10, window_bounds = array<i64: 16, 32>}, {transform_indices = @transform_11, window_bounds = array<i64: 16, 32>}]} {
    %c0_i32 = arith.constant 0 : i32
    %0 = arith.cmpi eq, %arg2, %c0_i32 : i32
    %1 = arith.extui %0 : i1 to i32
    %c0_i32_0 = arith.constant 0 : i32
    %2 = arith.cmpi ne, %1, %c0_i32_0 : i32
    scf.if %2 {
      %cst_36 = arith.constant 0.000000e+00 : f32
      %36 = vector.broadcast %cst_36 : f32 to vector<16x32xf32>
      %c0_37 = arith.constant 0 : index
      %c0_38 = arith.constant 0 : index
      %37 = vector.load %arg15[%c0_37, %c0_38] : memref<16x32xf32, #tpu.memory_space<vmem>>, vector<16x32xf32>
      tpu.vector_store %arg15[%c0_37, %c0_38], %36 {strides = array<i32>} : memref<16x32xf32, #tpu.memory_space<vmem>>, vector<16x32xf32>,
    } else {
    }
    %c0 = arith.constant 0 : index
    %c0_1 = arith.constant 0 : index
    %3 = vector.load %arg15[%c0, %c0_1] : memref<16x32xf32, #tpu.memory_space<vmem>>, vector<16x32xf32>
    %c0_2 = arith.constant 0 : index
    %c0_3 = arith.constant 0 : index
    %4 = vector.load %arg3[%c0_2, %c0_3] : memref<16x32xf32, #tpu.memory_space<vmem>>, vector<16x32xf32>
    %c0_4 = arith.constant 0 : index
    %c0_5 = arith.constant 0 : index
    %5 = vector.load %arg6[%c0_4, %c0_5] : memref<32x32xf32, #tpu.memory_space<vmem>>, vector<32x32xf32>
    %cst = arith.constant dense<0.000000e+00> : vector<16x32xf32>
    %6 = tpu.matmul %4, %5, %cst {dimension_numbers = #tpu.dot_dimension_numbers<[1], [0], [0], [1], [0, 0, 1, 1], [], []>} : vector<16x32xf32>, vector<32x32xf32>, vector<16x32xf32> -> vector<16x32xf32>
    %7 = arith.addf %3, %6 : vector<16x32xf32>
    %c0_6 = arith.constant 0 : index
    %c0_7 = arith.constant 0 : index
    %8 = vector.load %arg15[%c0_6, %c0_7] : memref<16x32xf32, #tpu.memory_space<vmem>>, vector<16x32xf32>
    tpu.vector_store %arg15[%c0_6, %c0_7], %7 {strides = array<i32>} : memref<16x32xf32, #tpu.memory_space<vmem>>, vector<16x32xf32>,
    %c0_i32_8 = arith.constant 0 : i32
    %9 = arith.cmpi eq, %arg2, %c0_i32_8 : i32
    %10 = arith.extui %9 : i1 to i32
    %c0_i32_9 = arith.constant 0 : i32
    %11 = arith.cmpi ne, %10, %c0_i32_9 : i32
    scf.if %11 {
      %c0_36 = arith.constant 0 : index
      %c0_37 = arith.constant 0 : index
      %36 = vector.load %arg15[%c0_36, %c0_37] : memref<16x32xf32, #tpu.memory_space<vmem>>, vector<16x32xf32>
      %c0_38 = arith.constant 0 : index
      %c0_39 = arith.constant 0 : index
      %37 = vector.load %arg9[%c0_38, %c0_39] : memref<1x32xf32, #tpu.memory_space<vmem>>, vector<1x32xf32>
      %38 = vector.broadcast %37 : vector<1x32xf32> to vector<16x32xf32>
      %39 = arith.addf %36, %38 : vector<16x32xf32>
      %c0_40 = arith.constant 0 : index
      %c0_41 = arith.constant 0 : index
      %40 = vector.load %arg12[%c0_40, %c0_41] : memref<16x32xf32, #tpu.memory_space<vmem>>, vector<16x32xf32>
      tpu.vector_store %arg12[%c0_40, %c0_41], %39 {strides = array<i32>} : memref<16x32xf32, #tpu.memory_space<vmem>>, vector<16x32xf32>,
    } else {
    }
    %c0_i32_10 = arith.constant 0 : i32
    %12 = arith.cmpi eq, %arg2, %c0_i32_10 : i32
    %13 = arith.extui %12 : i1 to i32
    %c0_i32_11 = arith.constant 0 : i32
    %14 = arith.cmpi ne, %13, %c0_i32_11 : i32
    scf.if %14 {
      %cst_36 = arith.constant 0.000000e+00 : f32
      %36 = vector.broadcast %cst_36 : f32 to vector<16x32xf32>
      %c0_37 = arith.constant 0 : index
      %c0_38 = arith.constant 0 : index
      %37 = vector.load %arg16[%c0_37, %c0_38] : memref<16x32xf32, #tpu.memory_space<vmem>>, vector<16x32xf32>
      tpu.vector_store %arg16[%c0_37, %c0_38], %36 {strides = array<i32>} : memref<16x32xf32, #tpu.memory_space<vmem>>, vector<16x32xf32>,
    } else {
    }
    %c0_12 = arith.constant 0 : index
    %c0_13 = arith.constant 0 : index
    %15 = vector.load %arg16[%c0_12, %c0_13] : memref<16x32xf32, #tpu.memory_space<vmem>>, vector<16x32xf32>
    %c0_14 = arith.constant 0 : index
    %c0_15 = arith.constant 0 : index
    %16 = vector.load %arg4[%c0_14, %c0_15] : memref<16x32xf32, #tpu.memory_space<vmem>>, vector<16x32xf32>
    %c0_16 = arith.constant 0 : index
    %c0_17 = arith.constant 0 : index
    %17 = vector.load %arg7[%c0_16, %c0_17] : memref<32x32xf32, #tpu.memory_space<vmem>>, vector<32x32xf32>
    %cst_18 = arith.constant dense<0.000000e+00> : vector<16x32xf32>
    %18 = tpu.matmul %16, %17, %cst_18 {dimension_numbers = #tpu.dot_dimension_numbers<[1], [0], [0], [1], [0, 0, 1, 1], [], []>} : vector<16x32xf32>, vector<32x32xf32>, vector<16x32xf32> -> vector<16x32xf32>
    %19 = arith.addf %15, %18 : vector<16x32xf32>
    %c0_19 = arith.constant 0 : index
    %c0_20 = arith.constant 0 : index
    %20 = vector.load %arg16[%c0_19, %c0_20] : memref<16x32xf32, #tpu.memory_space<vmem>>, vector<16x32xf32>
    tpu.vector_store %arg16[%c0_19, %c0_20], %19 {strides = array<i32>} : memref<16x32xf32, #tpu.memory_space<vmem>>, vector<16x32xf32>,
    %c0_i32_21 = arith.constant 0 : i32
    %21 = arith.cmpi eq, %arg2, %c0_i32_21 : i32
    %22 = arith.extui %21 : i1 to i32
    %c0_i32_22 = arith.constant 0 : i32
    %23 = arith.cmpi ne, %22, %c0_i32_22 : i32
    scf.if %23 {
      %c0_36 = arith.constant 0 : index
      %c0_37 = arith.constant 0 : index
      %36 = vector.load %arg16[%c0_36, %c0_37] : memref<16x32xf32, #tpu.memory_space<vmem>>, vector<16x32xf32>
      %c0_38 = arith.constant 0 : index
      %c0_39 = arith.constant 0 : index
      %37 = vector.load %arg10[%c0_38, %c0_39] : memref<1x32xf32, #tpu.memory_space<vmem>>, vector<1x32xf32>
      %38 = vector.broadcast %37 : vector<1x32xf32> to vector<16x32xf32>
      %39 = arith.addf %36, %38 : vector<16x32xf32>
      %c0_40 = arith.constant 0 : index
      %c0_41 = arith.constant 0 : index
      %40 = vector.load %arg13[%c0_40, %c0_41] : memref<16x32xf32, #tpu.memory_space<vmem>>, vector<16x32xf32>
      tpu.vector_store %arg13[%c0_40, %c0_41], %39 {strides = array<i32>} : memref<16x32xf32, #tpu.memory_space<vmem>>, vector<16x32xf32>,
    } else {
    }
    %c0_i32_23 = arith.constant 0 : i32
    %24 = arith.cmpi eq, %arg2, %c0_i32_23 : i32
    %25 = arith.extui %24 : i1 to i32
    %c0_i32_24 = arith.constant 0 : i32
    %26 = arith.cmpi ne, %25, %c0_i32_24 : i32
    scf.if %26 {
      %cst_36 = arith.constant 0.000000e+00 : f32
      %36 = vector.broadcast %cst_36 : f32 to vector<16x32xf32>
      %c0_37 = arith.constant 0 : index
      %c0_38 = arith.constant 0 : index
      %37 = vector.load %arg17[%c0_37, %c0_38] : memref<16x32xf32, #tpu.memory_space<vmem>>, vector<16x32xf32>
      tpu.vector_store %arg17[%c0_37, %c0_38], %36 {strides = array<i32>} : memref<16x32xf32, #tpu.memory_space<vmem>>, vector<16x32xf32>,
    } else {
    }
    %c0_25 = arith.constant 0 : index
    %c0_26 = arith.constant 0 : index
    %27 = vector.load %arg17[%c0_25, %c0_26] : memref<16x32xf32, #tpu.memory_space<vmem>>, vector<16x32xf32>
    %c0_27 = arith.constant 0 : index
    %c0_28 = arith.constant 0 : index
    %28 = vector.load %arg5[%c0_27, %c0_28] : memref<16x32xf32, #tpu.memory_space<vmem>>, vector<16x32xf32>
    %c0_29 = arith.constant 0 : index
    %c0_30 = arith.constant 0 : index
    %29 = vector.load %arg8[%c0_29, %c0_30] : memref<32x32xf32, #tpu.memory_space<vmem>>, vector<32x32xf32>
    %cst_31 = arith.constant dense<0.000000e+00> : vector<16x32xf32>
    %30 = tpu.matmul %28, %29, %cst_31 {dimension_numbers = #tpu.dot_dimension_numbers<[1], [0], [0], [1], [0, 0, 1, 1], [], []>} : vector<16x32xf32>, vector<32x32xf32>, vector<16x32xf32> -> vector<16x32xf32>
    %31 = arith.addf %27, %30 : vector<16x32xf32>
    %c0_32 = arith.constant 0 : index
    %c0_33 = arith.constant 0 : index
    %32 = vector.load %arg17[%c0_32, %c0_33] : memref<16x32xf32, #tpu.memory_space<vmem>>, vector<16x32xf32>
    tpu.vector_store %arg17[%c0_32, %c0_33], %31 {strides = array<i32>} : memref<16x32xf32, #tpu.memory_space<vmem>>, vector<16x32xf32>,
    %c0_i32_34 = arith.constant 0 : i32
    %33 = arith.cmpi eq, %arg2, %c0_i32_34 : i32
    %34 = arith.extui %33 : i1 to i32
    %c0_i32_35 = arith.constant 0 : i32
    %35 = arith.cmpi ne, %34, %c0_i32_35 : i32
    scf.if %35 {
      %c0_36 = arith.constant 0 : index
      %c0_37 = arith.constant 0 : index
      %36 = vector.load %arg17[%c0_36, %c0_37] : memref<16x32xf32, #tpu.memory_space<vmem>>, vector<16x32xf32>
      %c0_38 = arith.constant 0 : index
      %c0_39 = arith.constant 0 : index
      %37 = vector.load %arg11[%c0_38, %c0_39] : memref<1x32xf32, #tpu.memory_space<vmem>>, vector<1x32xf32>
      %38 = vector.broadcast %37 : vector<1x32xf32> to vector<16x32xf32>
      %39 = arith.addf %36, %38 : vector<16x32xf32>
      %c0_40 = arith.constant 0 : index
      %c0_41 = arith.constant 0 : index
      %40 = vector.load %arg14[%c0_40, %c0_41] : memref<16x32xf32, #tpu.memory_space<vmem>>, vector<16x32xf32>
      tpu.vector_store %arg14[%c0_40, %c0_41], %39 {strides = array<i32>} : memref<16x32xf32, #tpu.memory_space<vmem>>, vector<16x32xf32>,
    } else {
    }
    return
  }
  func.func @transform_0(%arg0: i32, %arg1: i32, %arg2: i32) -> (i32, i32) {
    %c0_i32 = arith.constant 0 : i32
    return %arg0, %arg2 : i32, i32
  }
  func.func @transform_1(%arg0: i32, %arg1: i32, %arg2: i32) -> (i32, i32) {
    %c0_i32 = arith.constant 0 : i32
    return %arg0, %arg2 : i32, i32
  }
  func.func @transform_2(%arg0: i32, %arg1: i32, %arg2: i32) -> (i32, i32) {
    %c0_i32 = arith.constant 0 : i32
    return %arg0, %arg2 : i32, i32
  }
  func.func @transform_3(%arg0: i32, %arg1: i32, %arg2: i32) -> (i32, i32) {
    %c0_i32 = arith.constant 0 : i32
    return %arg2, %arg1 : i32, i32
  }
  func.func @transform_4(%arg0: i32, %arg1: i32, %arg2: i32) -> (i32, i32) {
    %c0_i32 = arith.constant 0 : i32
    return %arg2, %arg1 : i32, i32
  }
  func.func @transform_5(%arg0: i32, %arg1: i32, %arg2: i32) -> (i32, i32) {
    %c0_i32 = arith.constant 0 : i32
    return %arg2, %arg1 : i32, i32
  }
  func.func @transform_6(%arg0: i32, %arg1: i32, %arg2: i32) -> (i32, i32) {
    %c0_i32 = arith.constant 0 : i32
    %c0_i32_0 = arith.constant 0 : i32
    return %c0_i32, %arg1 : i32, i32
  }
  func.func @transform_7(%arg0: i32, %arg1: i32, %arg2: i32) -> (i32, i32) {
    %c0_i32 = arith.constant 0 : i32
    %c0_i32_0 = arith.constant 0 : i32
    return %c0_i32, %arg1 : i32, i32
  }
  func.func @transform_8(%arg0: i32, %arg1: i32, %arg2: i32) -> (i32, i32) {
    %c0_i32 = arith.constant 0 : i32
    %c0_i32_0 = arith.constant 0 : i32
    return %c0_i32, %arg1 : i32, i32
  }
  func.func @transform_9(%arg0: i32, %arg1: i32, %arg2: i32) -> (i32, i32) {
    %c0_i32 = arith.constant 0 : i32
    return %arg0, %arg1 : i32, i32
  }
  func.func @transform_10(%arg0: i32, %arg1: i32, %arg2: i32) -> (i32, i32) {
    %c0_i32 = arith.constant 0 : i32
    return %arg0, %arg1 : i32, i32
  }
  func.func @transform_11(%arg0: i32, %arg1: i32, %arg2: i32) -> (i32, i32) {
    %c0_i32 = arith.constant 0 : i32
    return %arg0, %arg1 : i32, i32
  }
}

</mosaic_0001>

<bundles_post_ra>
// kernel: tpu_custom_call.1
= control target key start
LH: loop header
LB: loop body
LE: loop exit
PB: predicated region body
PF: predicated region fallthrough
CT: control target
= control target key end

     0   :  { %17 = vsyncpa [#allocation6], 0  ;;  %s932_s0 = inlined_call_operand.hbm [shape: f32[16,32], index: 0, kind: input, shape index: {}]   ;;  %s933_s1 = inlined_call_operand.hbm [shape: f32[16,32], index: 1, kind: input, shape index: {}]   ;;  %s934_s2 = inlined_call_operand.hbm [shape: f32[16,32], index: 2, kind: input, shape index: {}]   ;;  %s935_s3 = inlined_call_operand.hbm [shape: f32[32,32], index: 3, kind: input, shape index: {}]   ;;  %s936_s4 = inlined_call_operand.hbm [shape: f32[32,32], index: 4, kind: input, shape index: {}]   ;;  %s937_s5 = inlined_call_operand.hbm [shape: f32[32,32], index: 5, kind: input, shape index: {}]   ;;  %s938_s6 = inlined_call_operand.vmem [shape: f32[1,32], index: 6, kind: input, shape index: {}]   ;;  %s939_s7 = inlined_call_operand.vmem [shape: f32[1,32], index: 7, kind: input, shape index: {}]   ;;  %s940_s8 = inlined_call_operand.vmem [shape: f32[1,32], index: 8, kind: input, shape index: {}]   ;;  %s941_s9 = inlined_call_operand.hbm [shape: f32[16,32], index: 9, kind: output, shape index: {0}]   ;;  %s942_s10 = inlined_call_operand.hbm [shape: f32[16,32], index: 10, kind: output, shape index: {1}]   ;;  %s943_s11 = inlined_call_operand.hbm [shape: f32[16,32], index: 11, kind: output, shape index: {2}]  }
   0x1   :  { %18 = vsyncpa [#allocation9], 0 }
   0x2   :  { %19 = vsyncpa [#allocation12], 0 }
   0x3   :  { %20 = vsyncpa [#allocation15], 0 }
   0x4   :  { %21 = vsyncpa [#allocation7], 0 }
   0x5   :  { %22 = vsyncpa [#allocation18], 0  ;;  %s773_s17 = smov [#allocation8]   ;;  %s774_s19 = smov [#allocation11]  }
   0x6   :  { %s40_s18 = sshll.u32 %s773_s17, 4  ;;  %s64_s20 = sshll.u32 %s774_s19, 4  ;;  %s41_s18 = int_to_ptr.vmem [resolvable:$true] %s40_s18  ;;  %s65_s20 = int_to_ptr.vmem [resolvable:$true] %s64_s20 }
   0x7   :  { %s589_s21 = scalar_lea.vmem %s41_s18, 256  ;;  %p594_p1 = scmp.lt.s32.totalorder %s41_s18, %s41_s18 }
   0x8   :  { %p590_p0 = scmp.ne.s32.totalorder %s41_s18, %s589_s21  ;;  %p595_p2 = scmp.lt.s32.totalorder %s589_s21, %s589_s21 }
   0xa   :  { %p596_p3 = por %p595_p2, %p594_p1 }
   0xc   :  { %p597_p4 = pnand %p596_p3, %p590_p0 }
   0xe   :  { %600 = shalt.err (!%p597_p4)
}
   0xf   :  { %s775_s22 = smov 128   ;;  %s776_s23 = smov 8  }
  0x10   :  { %46 = dma.hbm_to_vmem [thread:$0]  %s933_s1, 256, %s41_s18, [#allocation9], %s775_s22, %s775_s22, %s776_s23  }
  0x11   :  { %s609_s26 = scalar_lea.vmem %s65_s20, 512  ;;  %p614_p6 = scmp.lt.s32.totalorder %s65_s20, %s65_s20 }
  0x12   :  { %p610_p5 = scmp.ne.s32.totalorder %s65_s20, %s609_s26  ;;  %p615_p7 = scmp.lt.s32.totalorder %s609_s26, %s609_s26 }
  0x14   :  { %p616_p8 = por %p615_p7, %p614_p6 }
  0x16   :  { %p617_p9 = pnand %p616_p8, %p610_p5 }
  0x18   :  { %620 = shalt.err (!%p617_p9)
}
  0x19   :  { %70 = dma.hbm_to_vmem [thread:$0]  %s935_s3, 512, %s65_s20, [#allocation12], %s775_s22, %s775_s22, %s776_s23  }
  0x1a   :  { %s777_s29 = smov [#allocation5]   ;;  %s778_s12 = smov [#allocation10]  }
  0x1b   :  { %s28_s30 = sshll.u32 %s777_s29, 4  ;;  %s52_s13 = sshll.u32 %s778_s12, 4  ;;  %s29_s30 = int_to_ptr.vmem [resolvable:$true] %s28_s30  ;;  %s53_s13 = int_to_ptr.vmem [resolvable:$true] %s52_s13 }
  0x1c   :  { %s629_s1 = scalar_lea.vmem %s29_s30, 256  ;;  %p634_p11 = scmp.lt.s32.totalorder %s29_s30, %s29_s30 }
  0x1d   :  { %p630_p10 = scmp.ne.s32.totalorder %s29_s30, %s629_s1  ;;  %p635_p12 = scmp.lt.s32.totalorder %s629_s1, %s629_s1 }
  0x1f   :  { %p636_p13 = por %p635_p12, %p634_p11 }
  0x21   :  { %p637_p0 = pnand %p636_p13, %p630_p10 }
  0x23   :  { %640 = shalt.err (!%p637_p0)
}
  0x24   :  { %34 = dma.hbm_to_vmem [thread:$0]  %s932_s0, 256, %s29_s30, [#allocation6], %s775_s22, %s775_s22, %s776_s23  }
  0x25   :  { %s649_s3 = scalar_lea.vmem %s53_s13, 256  ;;  %p654_p2 = scmp.lt.s32.totalorder %s53_s13, %s53_s13 }
  0x26   :  { %p650_p1 = scmp.ne.s32.totalorder %s53_s13, %s649_s3  ;;  %p655_p3 = scmp.lt.s32.totalorder %s649_s3, %s649_s3 }
  0x28   :  { %p656_p4 = por %p655_p3, %p654_p2 }
  0x2a   :  { %p657_p5 = pnand %p656_p4, %p650_p1 }
  0x2c   :  { %660 = shalt.err (!%p657_p5)
}
  0x2d   :  { %58 = dma.hbm_to_vmem [thread:$0]  %s934_s2, 256, %s53_s13, [#allocation9], %s775_s22, %s775_s22, %s776_s23  }
  0x2e   :  { %s779_s18 = smov [#allocation13]   ;;  %s780_s20 = smov [#allocation14]  }
  0x2f   :  { %s76_s19 = sshll.u32 %s779_s18, 4  ;;  %s88_s21 = sshll.u32 %s780_s20, 4  ;;  %s77_s19 = int_to_ptr.vmem [resolvable:$true] %s76_s19  ;;  %s89_s21 = int_to_ptr.vmem [resolvable:$true] %s88_s21 }
  0x30   :  { %s669_s0 = scalar_lea.vmem %s77_s19, 512  ;;  %p674_p7 = scmp.lt.s32.totalorder %s77_s19, %s77_s19 }
  0x31   :  { %p670_p6 = scmp.ne.s32.totalorder %s77_s19, %s669_s0  ;;  %p675_p8 = scmp.lt.s32.totalorder %s669_s0, %s669_s0 }
  0x33   :  { %p676_p9 = por %p675_p8, %p674_p7 }
  0x35   :  { %p677_p10 = pnand %p676_p9, %p670_p6 }
  0x37   :  { %680 = shalt.err (!%p677_p10)
}
  0x38   :  { %82 = dma.hbm_to_vmem [thread:$0]  %s936_s4, 512, %s77_s19, [#allocation12], %s775_s22, %s775_s22, %s776_s23  }
  0x39   :  { %s689_s2 = scalar_lea.vmem %s89_s21, 512  ;;  %p694_p12 = scmp.lt.s32.totalorder %s89_s21, %s89_s21 }
  0x3a   :  { %p690_p11 = scmp.ne.s32.totalorder %s89_s21, %s689_s2  ;;  %p695_p13 = scmp.lt.s32.totalorder %s689_s2, %s689_s2 }
  0x3c   :  { %p696_p0 = por %p695_p13, %p694_p12 }
  0x3e   :  { %p697_p1 = pnand %p696_p0, %p690_p11 }
  0x40   :  { %700 = shalt.err (!%p697_p1)
}
  0x41   :  { %94 = dma.hbm_to_vmem [thread:$0]  %s937_s5, 512, %s89_s21, [#allocation15], %s775_s22, %s775_s22, %s776_s23  }
  0x42   :  { %761 = dma.done.wait [#allocation6], 256  }
  0x43   :  { %762 = vsyncadd [#allocation6], 4294967040 }
  0x44   :  { %763 = dma.done.wait [#allocation9], 512  }
  0x45   :  { %764 = vsyncadd [#allocation9], 4294966784 }
  0x46   :  { %765 = dma.done.wait [#allocation12], 1024  }
  0x47   :  { %766 = vsyncadd [#allocation12], 4294966272 }
  0x48   :  { %767 = dma.done.wait [#allocation15], 512  }
  0x49   :  { %768 = vsyncadd [#allocation15], 4294966784  ;;  %vm123_vm0 = vcmask 261120   ;;  %v781_v0 = vmov 0.0   ;;  %v133_v1 = vld [vmem:[#allocation11 + $0x18] sm:$0xff]  ;;  %v132_v2 = vld [vmem:[#allocation11 + $0x10] sm:$0xff] }
  0x4a   :  { %125 = vst.msk [vmem:[#allocation2 + $0x8] sm:$0xff] %vm123_vm0, %v781_v0  ;;  %124 = vst.msk [vmem:[#allocation2] sm:$0xff] %vm123_vm0, %v781_v0  ;;  %536 = vmatprep.subr.mxu0 %v133_v1  ;;  %v245_v3 = vld [vmem:[#allocation13 + $0x18] sm:$0xff]  ;;  %v128_v4 = vld [vmem:[#allocation5] sm:$0xff]  ;;  %s782_s28 = smov [#allocation16]  }
  0x4b   :  { %236 = vst.msk [vmem:[#allocation3] sm:$0xff] %vm123_vm0, %v781_v0  ;;  %237 = vst.msk [vmem:[#allocation3 + $0x8] sm:$0xff] %vm123_vm0, %v781_v0  ;;  %537 = vmatpush3.msra.mxu0 %v133_v1  ;;  %v131_v5 = vld [vmem:[#allocation11 + $0x8] sm:$0xff]  ;;  %547 = vmatprep.subr.mxu1 %v245_v3  ;;  %v244_v6 = vld [vmem:[#allocation13 + $0x10] sm:$0xff]  ;;  %s463_s29 = sshll.u32 %s782_s28, 4  ;;  %s464_s29 = int_to_ptr.vmem [resolvable:$true] %s463_s29 }
  0x4c   :  { %347 = vst.msk [vmem:[#allocation4] sm:$0xff] %vm123_vm0, %v781_v0  ;;  %348 = vst.msk [vmem:[#allocation4 + $0x8] sm:$0xff] %vm123_vm0, %v781_v0  ;;  %538 = vmatprep.subr.mxu0 %v132_v2  ;;  %548 = vmatpush3.msra.mxu1 %v245_v3  ;;  %v130_v7 = vld [vmem:[#allocation11] sm:$0xff]  ;;  %v243_v8 = vld [vmem:[#allocation13 + $0x8] sm:$0xff]  ;;  %s701_s15 = scalar_lea.vmem %s464_s29, 256  ;;  %p706_p3 = scmp.lt.s32.totalorder %s464_s29, %s464_s29 }
  0x4d   :  { %539 = vmatpush3.msra.mxu0 %v132_v2  ;;  %544 = vmatprep.mubr.msk.f32.mxu0 %vm123_vm0, %v128_v4  ;;  %v129_v9 = vld [vmem:[#allocation5 + $0x8] sm:$0xff]  ;;  %v242_v11 = vld [vmem:[#allocation13] sm:$0xff]  ;;  %v355_v12 = vld [vmem:[#allocation14 + $0x10] sm:$0xff]  ;;  %p702_p2 = scmp.ne.s32.totalorder %s464_s29, %s701_s15  ;;  %p707_p4 = scmp.lt.s32.totalorder %s701_s15, %s701_s15 }
  0x4e   :  { %540 = vmatprep.subr.mxu0 %v131_v5  ;;  %549 = vmatprep.subr.mxu1 %v244_v6  ;;  %v356_v10 = vld [vmem:[#allocation14 + $0x18] sm:$0xff]  ;;  %v240_v13 = vld [vmem:[#allocation8] sm:$0xff]  ;;  %v354_v14 = vld [vmem:[#allocation14 + $0x8] sm:$0xff] }
  0x4f   :  { %541 = vmatpush3.msra.mxu0 %v131_v5  ;;  %550 = vmatpush3.msra.mxu1 %v244_v6  ;;  %v241_v15 = vld [vmem:[#allocation8 + $0x8] sm:$0xff]  ;;  %v351_v16 = vld [vmem:[#allocation10] sm:$0xff]  ;;  %v353_v17 = vld [vmem:[#allocation14] sm:$0xff]  ;;  %p708_p5 = por %p707_p4, %p706_p3 }
  0x50   :  { %542 = vmatprep.subr.mxu0 %v130_v7  ;;  %551 = vmatprep.subr.mxu1 %v243_v8  ;;  %v352_v18 = vld [vmem:[#allocation10 + $0x8] sm:$0xff]  ;;  %v511_v34 = vld [vmem:[%s938_s6] ss:$0 sm:$0xff]  ;;  %s783_s6 = smov [#allocation17]  }
  0x51   :  { %543 = vmatpush3.msra.mxu0 %v130_v7  ;;  %552 = vmatpush3.msra.mxu1 %v243_v8  ;;  %v127_v19 = vld [vmem:[#allocation2 + $0x8] sm:$0xff]  ;;  %v126_v21 = vld [vmem:[#allocation2] sm:$0xff]  ;;  %s475_s13 = sshll.u32 %s783_s6, 4  ;;  %p709_p6 = pnand %p708_p5, %p702_p2  ;;  %s476_s13 = int_to_ptr.vmem [resolvable:$true] %s475_s13 }
  0x52   :  { %545 = vmatmul.mubr.msk.f32.vlgmr.msra.gmra.mxu0 %vm123_vm0, %v129_v9  ;;  %558 = vmatprep.subr.mxu0 %v356_v10  ;;  %v239_v24 = vld [vmem:[#allocation3 + $0x8] sm:$0xff]  ;;  %v238_v27 = vld [vmem:[#allocation3] sm:$0xff]  ;;  %v514_v40 = vld [vmem:[%s939_s7] ss:$0 sm:$0xff] }
  0x53   :  { %559 = vmatpush3.msra.mxu0 %v356_v10  ;;  %553 = vmatprep.subr.mxu1 %v242_v11  ;;  %v350_v30 = vld [vmem:[#allocation4 + $0x8] sm:$0xff]  ;;  %v349_v33 = vld [vmem:[#allocation4] sm:$0xff] }
  0x54   :  { %560 = vmatprep.subr.mxu0 %v355_v12  ;;  %554 = vmatpush3.msra.mxu1 %v242_v11  ;;  %v517_v45 = vld [vmem:[%s940_s8] ss:$0 sm:$0xff] }
  0x55   :  { %561 = vmatpush3.msra.mxu0 %v355_v12  ;;  %555 = vmatprep.mubr.msk.f32.mxu1 %vm123_vm0, %v240_v13 }
  0x56   :  { %562 = vmatprep.subr.mxu0 %v354_v14  ;;  %556 = vmatmul.mubr.msk.f32.vlgmr.msra.gmra.mxu1 %vm123_vm0, %v241_v15 }
  0x57   :  { %563 = vmatpush3.msra.mxu0 %v354_v14  ;;  %566 = vmatprep.mubr.msk.f32.mxu0 %vm123_vm0, %v351_v16 }
  0x58   :  { %564 = vmatprep.subr.mxu0 %v353_v17 }
  0x59   :  { %565 = vmatpush3.msra.mxu0 %v353_v17 }
  0x5a   :  { %567 = vmatmul.mubr.msk.f32.vlgmr.msra.gmra.mxu0 %vm123_vm0, %v352_v18 }
 0x112   :  { %v546_v20 = vpop.f32.mrf.mxu0 }
 0x113   :  { %v217_v22 = vadd.f32 %v546_v20, %v127_v19 }
 0x114   :  { %v207_v23 = vpop.f32.mrf.mxu0 }
 0x115   :  { %219 = vst.msk [vmem:[#allocation2 + $0x8] sm:$0xff] %vm123_vm0, %v217_v22  ;;  %v216_v25 = vadd.f32 %v207_v23, %v126_v21 }
 0x116   :  { %v557_v26 = vpop.f32.mrf.mxu1 }
 0x117   :  { %218 = vst.msk [vmem:[#allocation2] sm:$0xff] %vm123_vm0, %v216_v25  ;;  %v328_v28 = vadd.f32 %v557_v26, %v239_v24 }
 0x118   :  { %v318_v29 = vpop.f32.mrf.mxu1 }
 0x119   :  { %330 = vst.msk [vmem:[#allocation3 + $0x8] sm:$0xff] %vm123_vm0, %v328_v28  ;;  %v327_v31 = vadd.f32 %v318_v29, %v238_v27 }
 0x11a   :  { %v568_v32 = vpop.f32.mrf.mxu0 }
 0x11b   :  { %329 = vst.msk [vmem:[#allocation3] sm:$0xff] %vm123_vm0, %v327_v31  ;;  %v439_v35 = vadd.f32 %v568_v32, %v350_v30 }
 0x11c   :  { %v429_v36 = vpop.f32.mrf.mxu0  ;;  %v224_v37 = vld [vmem:[#allocation2 + $0x8] sm:$0xff] }
 0x11d   :  { %441 = vst.msk [vmem:[#allocation4 + $0x8] sm:$0xff] %vm123_vm0, %v439_v35  ;;  %v438_v38 = vadd.f32 %v429_v36, %v349_v33  ;;  %v233_v39 = vadd.f32 %v511_v34, %v224_v37 }
 0x11e   :  { %v223_v41 = vld [vmem:[#allocation2] sm:$0xff] }
 0x11f   :  { %440 = vst.msk [vmem:[#allocation4] sm:$0xff] %vm123_vm0, %v438_v38  ;;  %v232_v42 = vadd.f32 %v511_v34, %v223_v41  ;;  %235 = vst.msk [vmem:[#allocation16 + $0x8] sm:$0xff] %vm123_vm0, %v233_v39 }
 0x120   :  { %v335_v43 = vld [vmem:[#allocation3 + $0x8] sm:$0xff] }
 0x121   :  { %v344_v44 = vadd.f32 %v514_v40, %v335_v43  ;;  %234 = vst.msk [vmem:[#allocation16] sm:$0xff] %vm123_vm0, %v232_v42 }
 0x122   :  { %v334_v46 = vld [vmem:[#allocation3] sm:$0xff] }
 0x123   :  { %712 = shalt.err (!%p709_p6)
}
 0x124   :  { %469 = dma.vmem_to_hbm [thread:$0]  %s464_s29, 256, %s941_s9, [#allocation7], %s775_s22, %s775_s22, %s776_s23   ;;  %v343_v47 = vadd.f32 %v514_v40, %v334_v46  ;;  %346 = vst.msk [vmem:[#allocation17 + $0x8] sm:$0xff] %vm123_vm0, %v344_v44  ;;  %v446_v48 = vld [vmem:[#allocation4 + $0x8] sm:$0xff] }
 0x125   :  { %s784_s8 = smov [#allocation19]   ;;  %v455_v49 = vadd.f32 %v517_v45, %v446_v48  ;;  %s721_s17 = scalar_lea.vmem %s476_s13, 256 }
 0x126   :  { %s487_s16 = sshll.u32 %s784_s8, 4  ;;  %345 = vst.msk [vmem:[#allocation17] sm:$0xff] %vm123_vm0, %v343_v47  ;;  %p722_p7 = scmp.ne.s32.totalorder %s476_s13, %s721_s17  ;;  %s488_s16 = int_to_ptr.vmem [resolvable:$true] %s487_s16 }
 0x127   :  { %p726_p8 = scmp.lt.s32.totalorder %s476_s13, %s476_s13  ;;  %p727_p9 = scmp.lt.s32.totalorder %s721_s17, %s721_s17 }
 0x129   :  { %p728_p10 = por %p727_p9, %p726_p8 }
 0x12b   :  { %p729_p11 = pnand %p728_p10, %p722_p7 }
 0x12d   :  { %732 = shalt.err (!%p729_p11)
}
 0x12e   :  { %481 = dma.vmem_to_hbm [thread:$0]  %s476_s13, 256, %s942_s10, [#allocation18], %s775_s22, %s775_s22, %s776_s23   ;;  %v445_v50 = vld [vmem:[#allocation4] sm:$0xff]  ;;  %457 = vst.msk [vmem:[#allocation19 + $0x8] sm:$0xff] %vm123_vm0, %v455_v49 }
 0x12f   :  { %v454_v51 = vadd.f32 %v517_v45, %v445_v50  ;;  %s741_s19 = scalar_lea.vmem %s488_s16, 256  ;;  %p746_p13 = scmp.lt.s32.totalorder %s488_s16, %s488_s16 }
 0x130   :  { %p742_p12 = scmp.ne.s32.totalorder %s488_s16, %s741_s19  ;;  %p747_p0 = scmp.lt.s32.totalorder %s741_s19, %s741_s19 }
 0x131   :  { %456 = vst.msk [vmem:[#allocation19] sm:$0xff] %vm123_vm0, %v454_v51 }
 0x132   :  { %p748_p1 = por %p747_p0, %p746_p13 }
 0x134   :  { %p749_p2 = pnand %p748_p1, %p742_p12 }
 0x136   :  { %752 = shalt.err (!%p749_p2)
}
 0x137   :  { %493 = dma.vmem_to_hbm [thread:$0]  %s488_s16, 256, %s943_s11, [#allocation18], %s775_s22, %s775_s22, %s776_s23  }
 0x138   :  { %769 = dma.done.wait [#allocation7], 256  }
 0x139   :  { %770 = vsyncadd [#allocation7], 4294967040 }
 0x13a   :  { %771 = dma.done.wait [#allocation18], 512  }
 0x13b   :  { %772 = vsyncadd [#allocation18], 4294966784 }
 0x13c   :  { %503 = vsyncpa [#allocation6], 1 }
 0x13d   :  { %504 = vsyncpa [#allocation9], 1 }
 0x13e   :  { %505 = vsyncpa [#allocation12], 1 }
 0x13f   :  { %506 = vsyncpa [#allocation15], 1 }
 0x140   :  { %507 = vsyncpa [#allocation7], 1 }
 0x141   :  { %508 = vsyncpa [#allocation18], 1 }

</bundles_post_ra>
